<compile_context>
chip_gen: v5e
topology: v5e:2x2
jax: 0.10.0
libtpu: 0.0.40
codegen_flags: <defaults>
</compile_context>

<pallas_src>
import functools

import jax
import jax.numpy as jnp
from jax.experimental import pallas as pl
from jax.experimental.pallas import tpu as pltpu


# ----------------------------------------------------------------------------
# In-kernel helpers
# ----------------------------------------------------------------------------
def _ln(x, gamma, beta, eps=1e-5):
    mu = jnp.mean(x, axis=-1, keepdims=True)
    var = jnp.mean((x - mu) ** 2, axis=-1, keepdims=True)
    return (x - mu) * jax.lax.rsqrt(var + eps) * gamma + beta


# ----------------------------------------------------------------------------
# Pallas kernel: one full TransformerEncoderLayer for one (batch, q-tile) block.
# Grid = (B, S // q_tile).  Weights are small enough here to be passed as full
# (grid-invariant) blocks.
# ----------------------------------------------------------------------------
def encoder_layer_kernel(nhead, head_dim, fused_qkv, fuse_final_norm, *refs):
    refs = list(refs)
    xq_ref = refs.pop(0)                                 # (1, tq, D) query tile
    xkv_ref = xq_ref if fused_qkv else refs.pop(0)       # (1, S, D) full sequence
    (wqkv_ref, bqkv_ref, wo_ref, bo_ref,
     g1_ref, b1_ref, w1_ref, bf1_ref, w2_ref, bf2_ref,
     g2_ref, b2_ref) = refs[:12]
    refs = refs[12:]
    if fuse_final_norm:
        gf_ref, bfn_ref = refs[0], refs[1]
        refs = refs[2:]
    out_ref = refs[0]

    D = nhead * head_dim
    xq = xq_ref[0]                       # (tq, D): queries + residual stream
    w_qkv = wqkv_ref[...]                # (D, 3D)  [Wq | Wk | Wv]
    b_qkv = bqkv_ref[...]                # (1, 3D)

    if fused_qkv:
        # Whole sequence is one tile -> single fused QKV MXU pass (N = 3D).
        qkv = jnp.dot(xq, w_qkv, preferred_element_type=jnp.float32) + b_qkv
        q = qkv[:, :D]
        k = qkv[:, D:2 * D]
        v = qkv[:, 2 * D:]
    else:
        # Query-tiled path: Q from the tile, fused K|V from the full sequence.
        xkv = xkv_ref[0]                 # (S, D)
        q = (jnp.dot(xq, w_qkv[:, :D], preferred_element_type=jnp.float32)
             + b_qkv[:, :D])
        kv = (jnp.dot(xkv, w_qkv[:, D:], preferred_element_type=jnp.float32)
              + b_qkv[:, D:])
        k = kv[:, :D]
        v = kv[:, D:]

    # --- multi-head self-attention ---
    # Heads processed as 2D MXU matmuls over the full query tile; the output
    # projection is accumulated per head so no jnp.concatenate / lane relayout
    # is needed to merge heads.
    scale = 1.0 / (float(head_dim) ** 0.5)
    w_o = wo_ref[...]                    # (D, D)
    tq = xq.shape[0]
    attn = jnp.zeros((tq, D), jnp.float32)
    for h in range(nhead):               # static loop over heads
        sl = slice(h * head_dim, (h + 1) * head_dim)
        s = jnp.dot(q[:, sl], k[:, sl].T,
                    preferred_element_type=jnp.float32) * scale
        s = s - jnp.max(s, axis=-1, keepdims=True)
        e = jnp.exp(s)
        # reciprocal on the EUP slot instead of a VPU divide
        p = e * pl.reciprocal(jnp.sum(e, axis=-1, keepdims=True), approx=True)
        o_h = jnp.dot(p, v[:, sl], preferred_element_type=jnp.float32)
        attn = attn + jnp.dot(o_h, w_o[sl, :],
                              preferred_element_type=jnp.float32)
    attn = attn + bo_ref[0]

    # --- residual + LayerNorm1 ---
    y = _ln(xq + attn, g1_ref[0], b1_ref[0])

    # --- feed-forward (ReLU) ---
    h1 = jnp.maximum(
        jnp.dot(y, w1_ref[...], preferred_element_type=jnp.float32) + bf1_ref[0],
        0.0)
    ff = jnp.dot(h1, w2_ref[...], preferred_element_type=jnp.float32) + bf2_ref[0]

    # --- residual + LayerNorm2 (+ fused final LayerNorm for the last layer) ---
    z = _ln(y + ff, g2_ref[0], b2_ref[0])
    if fuse_final_norm:
        z = _ln(z, gf_ref[0], bfn_ref[0])
    out_ref[0] = z.astype(out_ref.dtype)


# ----------------------------------------------------------------------------
# Wrappers
# ----------------------------------------------------------------------------
def _full_spec(shape):
    zeros = (0,) * len(shape)
    return pl.BlockSpec(shape, lambda b, qt, _z=zeros: _z)


def run_encoder_layer(x, p, nhead, *, q_tile=None, final_norm=None,
                      vmem_limit_bytes=32 * 1024 * 1024):
    B, S, D = x.shape
    dff = p["w1"].shape[1]
    assert D % nhead == 0
    head_dim = D // nhead

    if q_tile is None:
        q_tile = S if S <= 128 else 128
    assert S % q_tile == 0, "sequence length must be divisible by the query tile"
    n_qt = S // q_tile
    fused_qkv = (n_qt == 1)              # single tile -> one fused QKV matmul
    fuse_final = final_norm is not None

    in_specs = [pl.BlockSpec((1, q_tile, D), lambda b, qt: (b, qt, 0))]
    args = [x]
    if not fused_qkv:
        # Full sequence view of x for K/V when the queries are tiled.
        in_specs.append(pl.BlockSpec((1, S, D), lambda b, qt: (b, 0, 0)))
        args.append(x)

    weight_shapes = [
        ("wqkv", (D, 3 * D)), ("bqkv", (1, 3 * D)),
        ("wo", (D, D)), ("bo", (1, D)),
        ("g1", (1, D)), ("b1", (1, D)),
        ("w1", (D, dff)), ("bf1", (1, dff)),
        ("w2", (dff, D)), ("bf2", (1, D)),
        ("g2", (1, D)), ("b2", (1, D)),
    ]
    for name, shp in weight_shapes:
        in_specs.append(_full_spec(shp))
        args.append(p[name])
    if fuse_final:
        in_specs += [_full_spec((1, D)), _full_spec((1, D))]
        args += [final_norm["gamma"], final_norm["beta"]]

    kernel = functools.partial(encoder_layer_kernel, nhead, head_dim,
                               fused_qkv, fuse_final)
    return pl.pallas_call(
        kernel,
        out_shape=jax.ShapeDtypeStruct((B, S, D), x.dtype),
        grid=(B, n_qt),
        in_specs=in_specs,
        out_specs=pl.BlockSpec((1, q_tile, D), lambda b, qt: (b, qt, 0)),
        compiler_params=pltpu.CompilerParams(
            dimension_semantics=("parallel", "parallel"),
            vmem_limit_bytes=vmem_limit_bytes),
    )(*args)


def transformer_encoder(x, layer_params, nhead, final_norm=None, q_tile=None):
    """Equivalent of TransformerEncoder.forward with mask=None,
    src_key_padding_mask=None (eval mode)."""
    assert len(layer_params) >= 1
    out = x
    last = len(layer_params) - 1
    for i, p in enumerate(layer_params):
        fn = final_norm if i == last else None   # final LN fused into last layer
        out = run_encoder_layer(out, p, nhead, q_tile=q_tile, final_norm=fn)
    return out


# ----------------------------------------------------------------------------
# Deterministic synthetic parameters (QKV pre-fused once, at init time)
# ----------------------------------------------------------------------------
def init_layer_params(key, D, dff):
    ks = jax.random.split(key, 4)
    rn = lambda k, shape: 0.05 * jax.random.normal(k, shape, jnp.float32)
    return {
        "wqkv": rn(ks[0], (D, 3 * D)),                  # [Wq | Wk | Wv]
        "bqkv": jnp.zeros((1, 3 * D), jnp.float32),
        "wo": rn(ks[1], (D, D)), "bo": jnp.zeros((1, D), jnp.float32),
        "g1": jnp.ones((1, D), jnp.float32), "b1": jnp.zeros((1, D), jnp.float32),
        "w1": rn(ks[2], (D, dff)), "bf1": jnp.zeros((1, dff), jnp.float32),
        "w2": rn(ks[3], (dff, D)), "bf2": jnp.zeros((1, D), jnp.float32),
        "g2": jnp.ones((1, D), jnp.float32), "b2": jnp.zeros((1, D), jnp.float32),
    }


# ----------------------------------------------------------------------------
# Pure-JAX reference (same math) for correctness check
# ----------------------------------------------------------------------------
def _ref_layer(x, p, nhead):
    B, S, D = x.shape
    dh = D // nhead
    qkv = x @ p["wqkv"] + p["bqkv"][0]
    q, k, v = qkv[..., :D], qkv[..., D:2 * D], qkv[..., 2 * D:]
    qh = q.reshape(B, S, nhead, dh).transpose(0, 2, 1, 3)
    kh = k.reshape(B, S, nhead, dh).transpose(0, 2, 1, 3)
    vh = v.reshape(B, S, nhead, dh).transpose(0, 2, 1, 3)
    s = jnp.einsum("bhqd,bhkd->bhqk", qh, kh) / jnp.sqrt(dh).astype(jnp.float32)
    p_attn = jax.nn.softmax(s, axis=-1)
    o = jnp.einsum("bhqk,bhkd->bhqd", p_attn, vh)
    o = o.transpose(0, 2, 1, 3).reshape(B, S, D)
    attn = o @ p["wo"] + p["bo"][0]
    y = _ln(x + attn, p["g1"][0], p["b1"][0])
    h1 = jnp.maximum(y @ p["w1"] + p["bf1"][0], 0.0)
    ff = h1 @ p["w2"] + p["bf2"][0]
    return _ln(y + ff, p["g2"][0], p["b2"][0])


def _ref_encoder(x, layer_params, nhead, final_norm):
    out = x
    for p in layer_params:
        out = _ref_layer(out, p, nhead)
    if final_norm is not None:
        out = _ln(out, final_norm["gamma"][0], final_norm["beta"][0])
    return out


# ----------------------------------------------------------------------------
if __name__ == "__main__":
    master_key = jax.random.PRNGKey(0)

    def _check(B, S, D, nhead, dff, num_layers, q_tile):
        kx, kp = jax.random.split(jax.random.fold_in(master_key, S))
        x = jax.random.normal(kx, (B, S, D), jnp.float32)
        layer_keys = jax.random.split(kp, num_layers)
        params = [init_layer_params(layer_keys[i], D, dff)
                  for i in range(num_layers)]
        final_norm = {"gamma": jnp.full((1, D), 1.1, jnp.float32),
                      "beta": jnp.full((1, D), 0.05, jnp.float32)}

        out = transformer_encoder(x, params, nhead,
                                  final_norm=final_norm, q_tile=q_tile)
        out = jax.block_until_ready(out)
        ref = _ref_encoder(x, params, nhead, final_norm)
        assert out.shape == (B, S, D)
        # tolerance accounts for the approximate (EUP) softmax reciprocal
        assert jnp.allclose(out, ref, atol=1e-3, rtol=1e-3), \
            "mismatch vs reference"

    # Path 1: one query tile per batch element -> fully fused QKV matmul.
    _check(B=2, S=8, D=32, nhead=4, dff=64, num_layers=2, q_tile=None)
    # Path 2: query-tiled grid (B, S/q_tile) = (2, 2) -> Q + fused-KV matmuls.
    _check(B=2, S=16, D=32, nhead=4, dff=64, num_layers=2, q_tile=8)

    print("KERNEL_OK")
</pallas_src>

<mosaic_0001>
module attributes {stable_mosaic.version = 11 : i64} {
  func.func @encoder_layer_kernel(%arg0: i32, %arg1: i32, %arg2: memref<1x8x32xf32, #tpu.memory_space<vmem>>, %arg3: memref<32x96xf32, #tpu.memory_space<vmem>>, %arg4: memref<1x96xf32, #tpu.memory_space<vmem>>, %arg5: memref<32x32xf32, #tpu.memory_space<vmem>>, %arg6: memref<1x32xf32, #tpu.memory_space<vmem>>, %arg7: memref<1x32xf32, #tpu.memory_space<vmem>>, %arg8: memref<1x32xf32, #tpu.memory_space<vmem>>, %arg9: memref<32x64xf32, #tpu.memory_space<vmem>>, %arg10: memref<1x64xf32, #tpu.memory_space<vmem>>, %arg11: memref<64x32xf32, #tpu.memory_space<vmem>>, %arg12: memref<1x32xf32, #tpu.memory_space<vmem>>, %arg13: memref<1x32xf32, #tpu.memory_space<vmem>>, %arg14: memref<1x32xf32, #tpu.memory_space<vmem>>, %arg15: memref<1x8x32xf32, #tpu.memory_space<vmem>>) attributes {dimension_semantics = [#tpu.dimension_semantics<parallel>, #tpu.dimension_semantics<parallel>], iteration_bounds = array<i64: 2, 1>, scalar_prefetch = 0 : i64, scratch_operands = 0 : i64, tpu.core_type = #tpu.core_type<tc>, window_params = [{transform_indices = @transform_0, window_bounds = array<i64: 1, 8, 32>}, {pipeline_mode = #tpu.pipeline_mode<synchronous>, transform_indices = @transform_1, window_bounds = array<i64: 32, 96>}, {pipeline_mode = #tpu.pipeline_mode<synchronous>, transform_indices = @transform_2, window_bounds = array<i64: 1, 96>}, {pipeline_mode = #tpu.pipeline_mode<synchronous>, transform_indices = @transform_3, window_bounds = array<i64: 32, 32>}, {pipeline_mode = #tpu.pipeline_mode<synchronous>, transform_indices = @transform_4, window_bounds = array<i64: 1, 32>}, {pipeline_mode = #tpu.pipeline_mode<synchronous>, transform_indices = @transform_5, window_bounds = array<i64: 1, 32>}, {pipeline_mode = #tpu.pipeline_mode<synchronous>, transform_indices = @transform_6, window_bounds = array<i64: 1, 32>}, {pipeline_mode = #tpu.pipeline_mode<synchronous>, transform_indices = @transform_7, window_bounds = array<i64: 32, 64>}, {pipeline_mode = #tpu.pipeline_mode<synchronous>, transform_indices = @transform_8, window_bounds = array<i64: 1, 64>}, {pipeline_mode = #tpu.pipeline_mode<synchronous>, transform_indices = @transform_9, window_bounds = array<i64: 64, 32>}, {pipeline_mode = #tpu.pipeline_mode<synchronous>, transform_indices = @transform_10, window_bounds = array<i64: 1, 32>}, {pipeline_mode = #tpu.pipeline_mode<synchronous>, transform_indices = @transform_11, window_bounds = array<i64: 1, 32>}, {pipeline_mode = #tpu.pipeline_mode<synchronous>, transform_indices = @transform_12, window_bounds = array<i64: 1, 32>}, {transform_indices = @transform_13, window_bounds = array<i64: 1, 8, 32>}]} {
    %c0 = arith.constant 0 : index
    %c0_0 = arith.constant 0 : index
    %c0_1 = arith.constant 0 : index
    %0 = vector.load %arg2[%c0, %c0_0, %c0_1] : memref<1x8x32xf32, #tpu.memory_space<vmem>>, vector<1x8x32xf32>
    %1 = vector.shape_cast %0 : vector<1x8x32xf32> to vector<8x32xf32>
    %c0_2 = arith.constant 0 : index
    %c0_3 = arith.constant 0 : index
    %2 = vector.load %arg3[%c0_2, %c0_3] : memref<32x96xf32, #tpu.memory_space<vmem>>, vector<32x96xf32>
    %c0_4 = arith.constant 0 : index
    %c0_5 = arith.constant 0 : index
    %3 = vector.load %arg4[%c0_4, %c0_5] : memref<1x96xf32, #tpu.memory_space<vmem>>, vector<1x96xf32>
    %cst = arith.constant dense<0.000000e+00> : vector<8x96xf32>
    %4 = tpu.matmul %1, %2, %cst {dimension_numbers = #tpu.dot_dimension_numbers<[1], [0], [0], [1], [0, 0, 1, 1], [], []>} : vector<8x32xf32>, vector<32x96xf32>, vector<8x96xf32> -> vector<8x96xf32>
    %5 = vector.broadcast %3 : vector<1x96xf32> to vector<8x96xf32>
    %6 = arith.addf %4, %5 : vector<8x96xf32>
    %7 = vector.extract_strided_slice %6 {offsets = [0, 0], sizes = [8, 32], strides = [1, 1]} : vector<8x96xf32> to vector<8x32xf32>
    %8 = vector.extract_strided_slice %6 {offsets = [0, 32], sizes = [8, 32], strides = [1, 1]} : vector<8x96xf32> to vector<8x32xf32>
    %9 = vector.extract_strided_slice %6 {offsets = [0, 64], sizes = [8, 32], strides = [1, 1]} : vector<8x96xf32> to vector<8x32xf32>
    %c0_6 = arith.constant 0 : index
    %c0_7 = arith.constant 0 : index
    %10 = vector.load %arg5[%c0_6, %c0_7] : memref<32x32xf32, #tpu.memory_space<vmem>>, vector<32x32xf32>
    %cst_8 = arith.constant 0.000000e+00 : f32
    %11 = vector.broadcast %cst_8 : f32 to vector<8x32xf32>
    %12 = vector.extract_strided_slice %7 {offsets = [0, 0], sizes = [8, 8], strides = [1, 1]} : vector<8x32xf32> to vector<8x8xf32>
    %13 = vector.extract_strided_slice %8 {offsets = [0, 0], sizes = [8, 8], strides = [1, 1]} : vector<8x32xf32> to vector<8x8xf32>
    %14 = tpu.transpose %13, [1, 0] : vector<8x8xf32> -> vector<8x8xf32>
    %cst_9 = arith.constant dense<0.000000e+00> : vector<8x8xf32>
    %15 = tpu.matmul %12, %14, %cst_9 {dimension_numbers = #tpu.dot_dimension_numbers<[1], [0], [0], [1], [0, 0, 1, 1], [], []>} : vector<8x8xf32>, vector<8x8xf32>, vector<8x8xf32> -> vector<8x8xf32>
    %cst_10 = arith.constant 0.353553385 : f32
    %16 = vector.broadcast %cst_10 : f32 to vector<8x8xf32>
    %17 = arith.mulf %15, %16 : vector<8x8xf32>
    %cst_11 = arith.constant dense<0xFF800000> : vector<8xf32>
    %18 = vector.multi_reduction <maximumf>, %17, %cst_11 [1] : vector<8x8xf32> to vector<8xf32>
    %19 = vector.shape_cast %18 : vector<8xf32> to vector<8x1xf32>
    %20 = vector.broadcast %19 : vector<8x1xf32> to vector<8x8xf32>
    %21 = arith.subf %17, %20 : vector<8x8xf32>
    %22 = math.exp %21 : vector<8x8xf32>
    %cst_12 = arith.constant dense<0.000000e+00> : vector<8xf32>
    %23 = vector.multi_reduction <add>, %22, %cst_12 [1] : vector<8x8xf32> to vector<8xf32>
    %24 = vector.shape_cast %23 : vector<8xf32> to vector<8x1xf32>
    %25 = tpu.reciprocal %24 {approx = true} : vector<8x1xf32> -> vector<8x1xf32>
    %26 = vector.broadcast %25 : vector<8x1xf32> to vector<8x8xf32>
    %27 = arith.mulf %22, %26 : vector<8x8xf32>
    %28 = vector.extract_strided_slice %9 {offsets = [0, 0], sizes = [8, 8], strides = [1, 1]} : vector<8x32xf32> to vector<8x8xf32>
    %cst_13 = arith.constant dense<0.000000e+00> : vector<8x8xf32>
    %29 = tpu.matmul %27, %28, %cst_13 {dimension_numbers = #tpu.dot_dimension_numbers<[1], [0], [0], [1], [0, 0, 1, 1], [], []>} : vector<8x8xf32>, vector<8x8xf32>, vector<8x8xf32> -> vector<8x8xf32>
    %30 = vector.extract_strided_slice %10 {offsets = [0, 0], sizes = [8, 32], strides = [1, 1]} : vector<32x32xf32> to vector<8x32xf32>
    %cst_14 = arith.constant dense<0.000000e+00> : vector<8x32xf32>
    %31 = tpu.matmul %29, %30, %cst_14 {dimension_numbers = #tpu.dot_dimension_numbers<[1], [0], [0], [1], [0, 0, 1, 1], [], []>} : vector<8x8xf32>, vector<8x32xf32>, vector<8x32xf32> -> vector<8x32xf32>
    %32 = arith.addf %11, %31 : vector<8x32xf32>
    %33 = vector.extract_strided_slice %7 {offsets = [0, 8], sizes = [8, 8], strides = [1, 1]} : vector<8x32xf32> to vector<8x8xf32>
    %34 = vector.extract_strided_slice %8 {offsets = [0, 8], sizes = [8, 8], strides = [1, 1]} : vector<8x32xf32> to vector<8x8xf32>
    %35 = tpu.transpose %34, [1, 0] : vector<8x8xf32> -> vector<8x8xf32>
    %cst_15 = arith.constant dense<0.000000e+00> : vector<8x8xf32>
    %36 = tpu.matmul %33, %35, %cst_15 {dimension_numbers = #tpu.dot_dimension_numbers<[1], [0], [0], [1], [0, 0, 1, 1], [], []>} : vector<8x8xf32>, vector<8x8xf32>, vector<8x8xf32> -> vector<8x8xf32>
    %cst_16 = arith.constant 0.353553385 : f32
    %37 = vector.broadcast %cst_16 : f32 to vector<8x8xf32>
    %38 = arith.mulf %36, %37 : vector<8x8xf32>
    %cst_17 = arith.constant dense<0xFF800000> : vector<8xf32>
    %39 = vector.multi_reduction <maximumf>, %38, %cst_17 [1] : vector<8x8xf32> to vector<8xf32>
    %40 = vector.shape_cast %39 : vector<8xf32> to vector<8x1xf32>
    %41 = vector.broadcast %40 : vector<8x1xf32> to vector<8x8xf32>
    %42 = arith.subf %38, %41 : vector<8x8xf32>
    %43 = math.exp %42 : vector<8x8xf32>
    %cst_18 = arith.constant dense<0.000000e+00> : vector<8xf32>
    %44 = vector.multi_reduction <add>, %43, %cst_18 [1] : vector<8x8xf32> to vector<8xf32>
    %45 = vector.shape_cast %44 : vector<8xf32> to vector<8x1xf32>
    %46 = tpu.reciprocal %45 {approx = true} : vector<8x1xf32> -> vector<8x1xf32>
    %47 = vector.broadcast %46 : vector<8x1xf32> to vector<8x8xf32>
    %48 = arith.mulf %43, %47 : vector<8x8xf32>
    %49 = vector.extract_strided_slice %9 {offsets = [0, 8], sizes = [8, 8], strides = [1, 1]} : vector<8x32xf32> to vector<8x8xf32>
    %cst_19 = arith.constant dense<0.000000e+00> : vector<8x8xf32>
    %50 = tpu.matmul %48, %49, %cst_19 {dimension_numbers = #tpu.dot_dimension_numbers<[1], [0], [0], [1], [0, 0, 1, 1], [], []>} : vector<8x8xf32>, vector<8x8xf32>, vector<8x8xf32> -> vector<8x8xf32>
    %51 = vector.extract_strided_slice %10 {offsets = [8, 0], sizes = [8, 32], strides = [1, 1]} : vector<32x32xf32> to vector<8x32xf32>
    %cst_20 = arith.constant dense<0.000000e+00> : vector<8x32xf32>
    %52 = tpu.matmul %50, %51, %cst_20 {dimension_numbers = #tpu.dot_dimension_numbers<[1], [0], [0], [1], [0, 0, 1, 1], [], []>} : vector<8x8xf32>, vector<8x32xf32>, vector<8x32xf32> -> vector<8x32xf32>
    %53 = arith.addf %32, %52 : vector<8x32xf32>
    %54 = vector.extract_strided_slice %7 {offsets = [0, 16], sizes = [8, 8], strides = [1, 1]} : vector<8x32xf32> to vector<8x8xf32>
    %55 = vector.extract_strided_slice %8 {offsets = [0, 16], sizes = [8, 8], strides = [1, 1]} : vector<8x32xf32> to vector<8x8xf32>
    %56 = tpu.transpose %55, [1, 0] : vector<8x8xf32> -> vector<8x8xf32>
    %cst_21 = arith.constant dense<0.000000e+00> : vector<8x8xf32>
    %57 = tpu.matmul %54, %56, %cst_21 {dimension_numbers = #tpu.dot_dimension_numbers<[1], [0], [0], [1], [0, 0, 1, 1], [], []>} : vector<8x8xf32>, vector<8x8xf32>, vector<8x8xf32> -> vector<8x8xf32>
    %cst_22 = arith.constant 0.353553385 : f32
    %58 = vector.broadcast %cst_22 : f32 to vector<8x8xf32>
    %59 = arith.mulf %57, %58 : vector<8x8xf32>
    %cst_23 = arith.constant dense<0xFF800000> : vector<8xf32>
    %60 = vector.multi_reduction <maximumf>, %59, %cst_23 [1] : vector<8x8xf32> to vector<8xf32>
    %61 = vector.shape_cast %60 : vector<8xf32> to vector<8x1xf32>
    %62 = vector.broadcast %61 : vector<8x1xf32> to vector<8x8xf32>
    %63 = arith.subf %59, %62 : vector<8x8xf32>
    %64 = math.exp %63 : vector<8x8xf32>
    %cst_24 = arith.constant dense<0.000000e+00> : vector<8xf32>
    %65 = vector.multi_reduction <add>, %64, %cst_24 [1] : vector<8x8xf32> to vector<8xf32>
    %66 = vector.shape_cast %65 : vector<8xf32> to vector<8x1xf32>
    %67 = tpu.reciprocal %66 {approx = true} : vector<8x1xf32> -> vector<8x1xf32>
    %68 = vector.broadcast %67 : vector<8x1xf32> to vector<8x8xf32>
    %69 = arith.mulf %64, %68 : vector<8x8xf32>
    %70 = vector.extract_strided_slice %9 {offsets = [0, 16], sizes = [8, 8], strides = [1, 1]} : vector<8x32xf32> to vector<8x8xf32>
    %cst_25 = arith.constant dense<0.000000e+00> : vector<8x8xf32>
    %71 = tpu.matmul %69, %70, %cst_25 {dimension_numbers = #tpu.dot_dimension_numbers<[1], [0], [0], [1], [0, 0, 1, 1], [], []>} : vector<8x8xf32>, vector<8x8xf32>, vector<8x8xf32> -> vector<8x8xf32>
    %72 = vector.extract_strided_slice %10 {offsets = [16, 0], sizes = [8, 32], strides = [1, 1]} : vector<32x32xf32> to vector<8x32xf32>
    %cst_26 = arith.constant dense<0.000000e+00> : vector<8x32xf32>
    %73 = tpu.matmul %71, %72, %cst_26 {dimension_numbers = #tpu.dot_dimension_numbers<[1], [0], [0], [1], [0, 0, 1, 1], [], []>} : vector<8x8xf32>, vector<8x32xf32>, vector<8x32xf32> -> vector<8x32xf32>
    %74 = arith.addf %53, %73 : vector<8x32xf32>
    %75 = vector.extract_strided_slice %7 {offsets = [0, 24], sizes = [8, 8], strides = [1, 1]} : vector<8x32xf32> to vector<8x8xf32>
    %76 = vector.extract_strided_slice %8 {offsets = [0, 24], sizes = [8, 8], strides = [1, 1]} : vector<8x32xf32> to vector<8x8xf32>
    %77 = tpu.transpose %76, [1, 0] : vector<8x8xf32> -> vector<8x8xf32>
    %cst_27 = arith.constant dense<0.000000e+00> : vector<8x8xf32>
    %78 = tpu.matmul %75, %77, %cst_27 {dimension_numbers = #tpu.dot_dimension_numbers<[1], [0], [0], [1], [0, 0, 1, 1], [], []>} : vector<8x8xf32>, vector<8x8xf32>, vector<8x8xf32> -> vector<8x8xf32>
    %cst_28 = arith.constant 0.353553385 : f32
    %79 = vector.broadcast %cst_28 : f32 to vector<8x8xf32>
    %80 = arith.mulf %78, %79 : vector<8x8xf32>
    %cst_29 = arith.constant dense<0xFF800000> : vector<8xf32>
    %81 = vector.multi_reduction <maximumf>, %80, %cst_29 [1] : vector<8x8xf32> to vector<8xf32>
    %82 = vector.shape_cast %81 : vector<8xf32> to vector<8x1xf32>
    %83 = vector.broadcast %82 : vector<8x1xf32> to vector<8x8xf32>
    %84 = arith.subf %80, %83 : vector<8x8xf32>
    %85 = math.exp %84 : vector<8x8xf32>
    %cst_30 = arith.constant dense<0.000000e+00> : vector<8xf32>
    %86 = vector.multi_reduction <add>, %85, %cst_30 [1] : vector<8x8xf32> to vector<8xf32>
    %87 = vector.shape_cast %86 : vector<8xf32> to vector<8x1xf32>
    %88 = tpu.reciprocal %87 {approx = true} : vector<8x1xf32> -> vector<8x1xf32>
    %89 = vector.broadcast %88 : vector<8x1xf32> to vector<8x8xf32>
    %90 = arith.mulf %85, %89 : vector<8x8xf32>
    %91 = vector.extract_strided_slice %9 {offsets = [0, 24], sizes = [8, 8], strides = [1, 1]} : vector<8x32xf32> to vector<8x8xf32>
    %cst_31 = arith.constant dense<0.000000e+00> : vector<8x8xf32>
    %92 = tpu.matmul %90, %91, %cst_31 {dimension_numbers = #tpu.dot_dimension_numbers<[1], [0], [0], [1], [0, 0, 1, 1], [], []>} : vector<8x8xf32>, vector<8x8xf32>, vector<8x8xf32> -> vector<8x8xf32>
    %93 = vector.extract_strided_slice %10 {offsets = [24, 0], sizes = [8, 32], strides = [1, 1]} : vector<32x32xf32> to vector<8x32xf32>
    %cst_32 = arith.constant dense<0.000000e+00> : vector<8x32xf32>
    %94 = tpu.matmul %92, %93, %cst_32 {dimension_numbers = #tpu.dot_dimension_numbers<[1], [0], [0], [1], [0, 0, 1, 1], [], []>} : vector<8x8xf32>, vector<8x32xf32>, vector<8x32xf32> -> vector<8x32xf32>
    %95 = arith.addf %74, %94 : vector<8x32xf32>
    %c0_33 = arith.constant 0 : index
    %c0_34 = arith.constant 0 : index
    %96 = vector.load %arg6[%c0_33, %c0_34] : memref<1x32xf32, #tpu.memory_space<vmem>>, vector<1x32xf32>
    %97 = vector.shape_cast %96 : vector<1x32xf32> to vector<32xf32>
    %98 = vector.shape_cast %97 : vector<32xf32> to vector<1x32xf32>
    %99 = vector.broadcast %98 : vector<1x32xf32> to vector<8x32xf32>
    %100 = arith.addf %95, %99 : vector<8x32xf32>
    %101 = arith.addf %1, %100 : vector<8x32xf32>
    %c0_35 = arith.constant 0 : index
    %c0_36 = arith.constant 0 : index
    %102 = vector.load %arg7[%c0_35, %c0_36] : memref<1x32xf32, #tpu.memory_space<vmem>>, vector<1x32xf32>
    %103 = vector.shape_cast %102 : vector<1x32xf32> to vector<32xf32>
    %c0_37 = arith.constant 0 : index
    %c0_38 = arith.constant 0 : index
    %104 = vector.load %arg8[%c0_37, %c0_38] : memref<1x32xf32, #tpu.memory_space<vmem>>, vector<1x32xf32>
    %105 = vector.shape_cast %104 : vector<1x32xf32> to vector<32xf32>
    %cst_39 = arith.constant dense<0.000000e+00> : vector<8xf32>
    %106 = vector.multi_reduction <add>, %101, %cst_39 [1] : vector<8x32xf32> to vector<8xf32>
    %107 = vector.shape_cast %106 : vector<8xf32> to vector<8x1xf32>
    %cst_40 = arith.constant 3.200000e+01 : f32
    %108 = vector.broadcast %cst_40 : f32 to vector<8x1xf32>
    %109 = arith.divf %107, %108 : vector<8x1xf32>
    %110 = vector.broadcast %109 : vector<8x1xf32> to vector<8x32xf32>
    %111 = arith.subf %101, %110 : vector<8x32xf32>
    %112 = arith.mulf %111, %111 : vector<8x32xf32>
    %cst_41 = arith.constant dense<0.000000e+00> : vector<8xf32>
    %113 = vector.multi_reduction <add>, %112, %cst_41 [1] : vector<8x32xf32> to vector<8xf32>
    %114 = vector.shape_cast %113 : vector<8xf32> to vector<8x1xf32>
    %cst_42 = arith.constant 3.200000e+01 : f32
    %115 = vector.broadcast %cst_42 : f32 to vector<8x1xf32>
    %116 = arith.divf %114, %115 : vector<8x1xf32>
    %117 = vector.broadcast %109 : vector<8x1xf32> to vector<8x32xf32>
    %118 = arith.subf %101, %117 : vector<8x32xf32>
    %cst_43 = arith.constant 9.99999974E-6 : f32
    %119 = vector.broadcast %cst_43 : f32 to vector<8x1xf32>
    %120 = arith.addf %116, %119 : vector<8x1xf32>
    %121 = math.rsqrt %120 : vector<8x1xf32>
    %122 = vector.broadcast %121 : vector<8x1xf32> to vector<8x32xf32>
    %123 = arith.mulf %118, %122 : vector<8x32xf32>
    %124 = vector.shape_cast %103 : vector<32xf32> to vector<1x32xf32>
    %125 = vector.broadcast %124 : vector<1x32xf32> to vector<8x32xf32>
    %126 = arith.mulf %123, %125 : vector<8x32xf32>
    %127 = vector.shape_cast %105 : vector<32xf32> to vector<1x32xf32>
    %128 = vector.broadcast %127 : vector<1x32xf32> to vector<8x32xf32>
    %129 = arith.addf %126, %128 : vector<8x32xf32>
    %c0_44 = arith.constant 0 : index
    %c0_45 = arith.constant 0 : index
    %130 = vector.load %arg9[%c0_44, %c0_45] : memref<32x64xf32, #tpu.memory_space<vmem>>, vector<32x64xf32>
    %cst_46 = arith.constant dense<0.000000e+00> : vector<8x64xf32>
    %131 = tpu.matmul %129, %130, %cst_46 {dimension_numbers = #tpu.dot_dimension_numbers<[1], [0], [0], [1], [0, 0, 1, 1], [], []>} : vector<8x32xf32>, vector<32x64xf32>, vector<8x64xf32> -> vector<8x64xf32>
    %c0_47 = arith.constant 0 : index
    %c0_48 = arith.constant 0 : index
    %132 = vector.load %arg10[%c0_47, %c0_48] : memref<1x64xf32, #tpu.memory_space<vmem>>, vector<1x64xf32>
    %133 = vector.shape_cast %132 : vector<1x64xf32> to vector<64xf32>
    %134 = vector.shape_cast %133 : vector<64xf32> to vector<1x64xf32>
    %135 = vector.broadcast %134 : vector<1x64xf32> to vector<8x64xf32>
    %136 = arith.addf %131, %135 : vector<8x64xf32>
    %cst_49 = arith.constant 0.000000e+00 : f32
    %137 = vector.broadcast %cst_49 : f32 to vector<8x64xf32>
    %138 = arith.maximumf %136, %137 : vector<8x64xf32>
    %c0_50 = arith.constant 0 : index
    %c0_51 = arith.constant 0 : index
    %139 = vector.load %arg11[%c0_50, %c0_51] : memref<64x32xf32, #tpu.memory_space<vmem>>, vector<64x32xf32>
    %cst_52 = arith.constant dense<0.000000e+00> : vector<8x32xf32>
    %140 = tpu.matmul %138, %139, %cst_52 {dimension_numbers = #tpu.dot_dimension_numbers<[1], [0], [0], [1], [0, 0, 1, 1], [], []>} : vector<8x64xf32>, vector<64x32xf32>, vector<8x32xf32> -> vector<8x32xf32>
    %c0_53 = arith.constant 0 : index
    %c0_54 = arith.constant 0 : index
    %141 = vector.load %arg12[%c0_53, %c0_54] : memref<1x32xf32, #tpu.memory_space<vmem>>, vector<1x32xf32>
    %142 = vector.shape_cast %141 : vector<1x32xf32> to vector<32xf32>
    %143 = vector.shape_cast %142 : vector<32xf32> to vector<1x32xf32>
    %144 = vector.broadcast %143 : vector<1x32xf32> to vector<8x32xf32>
    %145 = arith.addf %140, %144 : vector<8x32xf32>
    %146 = arith.addf %129, %145 : vector<8x32xf32>
    %c0_55 = arith.constant 0 : index
    %c0_56 = arith.constant 0 : index
    %147 = vector.load %arg13[%c0_55, %c0_56] : memref<1x32xf32, #tpu.memory_space<vmem>>, vector<1x32xf32>
    %148 = vector.shape_cast %147 : vector<1x32xf32> to vector<32xf32>
    %c0_57 = arith.constant 0 : index
    %c0_58 = arith.constant 0 : index
    %149 = vector.load %arg14[%c0_57, %c0_58] : memref<1x32xf32, #tpu.memory_space<vmem>>, vector<1x32xf32>
    %150 = vector.shape_cast %149 : vector<1x32xf32> to vector<32xf32>
    %cst_59 = arith.constant dense<0.000000e+00> : vector<8xf32>
    %151 = vector.multi_reduction <add>, %146, %cst_59 [1] : vector<8x32xf32> to vector<8xf32>
    %152 = vector.shape_cast %151 : vector<8xf32> to vector<8x1xf32>
    %cst_60 = arith.constant 3.200000e+01 : f32
    %153 = vector.broadcast %cst_60 : f32 to vector<8x1xf32>
    %154 = arith.divf %152, %153 : vector<8x1xf32>
    %155 = vector.broadcast %154 : vector<8x1xf32> to vector<8x32xf32>
    %156 = arith.subf %146, %155 : vector<8x32xf32>
    %157 = arith.mulf %156, %156 : vector<8x32xf32>
    %cst_61 = arith.constant dense<0.000000e+00> : vector<8xf32>
    %158 = vector.multi_reduction <add>, %157, %cst_61 [1] : vector<8x32xf32> to vector<8xf32>
    %159 = vector.shape_cast %158 : vector<8xf32> to vector<8x1xf32>
    %cst_62 = arith.constant 3.200000e+01 : f32
    %160 = vector.broadcast %cst_62 : f32 to vector<8x1xf32>
    %161 = arith.divf %159, %160 : vector<8x1xf32>
    %162 = vector.broadcast %154 : vector<8x1xf32> to vector<8x32xf32>
    %163 = arith.subf %146, %162 : vector<8x32xf32>
    %cst_63 = arith.constant 9.99999974E-6 : f32
    %164 = vector.broadcast %cst_63 : f32 to vector<8x1xf32>
    %165 = arith.addf %161, %164 : vector<8x1xf32>
    %166 = math.rsqrt %165 : vector<8x1xf32>
    %167 = vector.broadcast %166 : vector<8x1xf32> to vector<8x32xf32>
    %168 = arith.mulf %163, %167 : vector<8x32xf32>
    %169 = vector.shape_cast %148 : vector<32xf32> to vector<1x32xf32>
    %170 = vector.broadcast %169 : vector<1x32xf32> to vector<8x32xf32>
    %171 = arith.mulf %168, %170 : vector<8x32xf32>
    %172 = vector.shape_cast %150 : vector<32xf32> to vector<1x32xf32>
    %173 = vector.broadcast %172 : vector<1x32xf32> to vector<8x32xf32>
    %174 = arith.addf %171, %173 : vector<8x32xf32>
    %c0_64 = arith.constant 0 : index
    %c0_65 = arith.constant 0 : index
    %c0_66 = arith.constant 0 : index
    %175 = vector.load %arg15[%c0_64, %c0_65, %c0_66] : memref<1x8x32xf32, #tpu.memory_space<vmem>>, vector<1x8x32xf32>
    %176 = vector.shape_cast %175 : vector<1x8x32xf32> to vector<8x32xf32>
    %177 = vector.shape_cast %174 : vector<8x32xf32> to vector<1x8x32xf32>
    tpu.vector_store %arg15[%c0_64, %c0_65, %c0_66], %177 {strides = array<i32>} : memref<1x8x32xf32, #tpu.memory_space<vmem>>, vector<1x8x32xf32>,
    return
  }
  func.func @transform_0(%arg0: i32, %arg1: i32) -> (i32, i32, i32) {
    %c0_i32 = arith.constant 0 : i32
    %c0_i32_0 = arith.constant 0 : i32
    return %arg0, %arg1, %c0_i32 : i32, i32, i32
  }
  func.func @transform_1(%arg0: i32, %arg1: i32) -> (i32, i32) {
    %c0_i32 = arith.constant 0 : i32
    %c0_i32_0 = arith.constant 0 : i32
    %c0_i32_1 = arith.constant 0 : i32
    return %c0_i32, %c0_i32_0 : i32, i32
  }
  func.func @transform_2(%arg0: i32, %arg1: i32) -> (i32, i32) {
    %c0_i32 = arith.constant 0 : i32
    %c0_i32_0 = arith.constant 0 : i32
    %c0_i32_1 = arith.constant 0 : i32
    return %c0_i32, %c0_i32_0 : i32, i32
  }
  func.func @transform_3(%arg0: i32, %arg1: i32) -> (i32, i32) {
    %c0_i32 = arith.constant 0 : i32
    %c0_i32_0 = arith.constant 0 : i32
    %c0_i32_1 = arith.constant 0 : i32
    return %c0_i32, %c0_i32_0 : i32, i32
  }
  func.func @transform_4(%arg0: i32, %arg1: i32) -> (i32, i32) {
    %c0_i32 = arith.constant 0 : i32
    %c0_i32_0 = arith.constant 0 : i32
    %c0_i32_1 = arith.constant 0 : i32
    return %c0_i32, %c0_i32_0 : i32, i32
  }
  func.func @transform_5(%arg0: i32, %arg1: i32) -> (i32, i32) {
    %c0_i32 = arith.constant 0 : i32
    %c0_i32_0 = arith.constant 0 : i32
    %c0_i32_1 = arith.constant 0 : i32
    return %c0_i32, %c0_i32_0 : i32, i32
  }
  func.func @transform_6(%arg0: i32, %arg1: i32) -> (i32, i32) {
    %c0_i32 = arith.constant 0 : i32
    %c0_i32_0 = arith.constant 0 : i32
    %c0_i32_1 = arith.constant 0 : i32
    return %c0_i32, %c0_i32_0 : i32, i32
  }
  func.func @transform_7(%arg0: i32, %arg1: i32) -> (i32, i32) {
    %c0_i32 = arith.constant 0 : i32
    %c0_i32_0 = arith.constant 0 : i32
    %c0_i32_1 = arith.constant 0 : i32
    return %c0_i32, %c0_i32_0 : i32, i32
  }
  func.func @transform_8(%arg0: i32, %arg1: i32) -> (i32, i32) {
    %c0_i32 = arith.constant 0 : i32
    %c0_i32_0 = arith.constant 0 : i32
    %c0_i32_1 = arith.constant 0 : i32
    return %c0_i32, %c0_i32_0 : i32, i32
  }
  func.func @transform_9(%arg0: i32, %arg1: i32) -> (i32, i32) {
    %c0_i32 = arith.constant 0 : i32
    %c0_i32_0 = arith.constant 0 : i32
    %c0_i32_1 = arith.constant 0 : i32
    return %c0_i32, %c0_i32_0 : i32, i32
  }
  func.func @transform_10(%arg0: i32, %arg1: i32) -> (i32, i32) {
    %c0_i32 = arith.constant 0 : i32
    %c0_i32_0 = arith.constant 0 : i32
    %c0_i32_1 = arith.constant 0 : i32
    return %c0_i32, %c0_i32_0 : i32, i32
  }
  func.func @transform_11(%arg0: i32, %arg1: i32) -> (i32, i32) {
    %c0_i32 = arith.constant 0 : i32
    %c0_i32_0 = arith.constant 0 : i32
    %c0_i32_1 = arith.constant 0 : i32
    return %c0_i32, %c0_i32_0 : i32, i32
  }
  func.func @transform_12(%arg0: i32, %arg1: i32) -> (i32, i32) {
    %c0_i32 = arith.constant 0 : i32
    %c0_i32_0 = arith.constant 0 : i32
    %c0_i32_1 = arith.constant 0 : i32
    return %c0_i32, %c0_i32_0 : i32, i32
  }
  func.func @transform_13(%arg0: i32, %arg1: i32) -> (i32, i32, i32) {
    %c0_i32 = arith.constant 0 : i32
    %c0_i32_0 = arith.constant 0 : i32
    return %arg0, %arg1, %c0_i32 : i32, i32, i32
  }
}

</mosaic_0001>

<bundles_post_ra>
// kernel: tpu_custom_call.1
= control target key start
LH: loop header
LB: loop body
LE: loop exit
PB: predicated region body
PF: predicated region fallthrough
CT: control target
= control target key end

     0   :  { %s1712_s0 = inlined_call_operand.hbm [shape: f32[2,8,32], index: 0, kind: input, shape index: {}]   ;;  %s1713_s1 = inlined_call_operand.vmem [shape: f32[32,96], index: 1, kind: input, shape index: {}]   ;;  %s1714_s2 = inlined_call_operand.vmem [shape: f32[1,96], index: 2, kind: input, shape index: {}]   ;;  %s1715_s3 = inlined_call_operand.vmem [shape: f32[32,32], index: 3, kind: input, shape index: {}]   ;;  %s1716_s4 = inlined_call_operand.vmem [shape: f32[1,32], index: 4, kind: input, shape index: {}]   ;;  %s1717_s5 = inlined_call_operand.vmem [shape: f32[1,32], index: 5, kind: input, shape index: {}]   ;;  %s1718_s6 = inlined_call_operand.vmem [shape: f32[1,32], index: 6, kind: input, shape index: {}]   ;;  %s1719_s7 = inlined_call_operand.vmem [shape: f32[32,64], index: 7, kind: input, shape index: {}]   ;;  %s1720_s8 = inlined_call_operand.vmem [shape: f32[1,64], index: 8, kind: input, shape index: {}]   ;;  %s1721_s9 = inlined_call_operand.vmem [shape: f32[64,32], index: 9, kind: input, shape index: {}]   ;;  %s1722_s10 = inlined_call_operand.vmem [shape: f32[1,32], index: 10, kind: input, shape index: {}]   ;;  %s1723_s11 = inlined_call_operand.vmem [shape: f32[1,32], index: 11, kind: input, shape index: {}]   ;;  %s1724_s12 = inlined_call_operand.vmem [shape: f32[1,32], index: 12, kind: input, shape index: {}]   ;;  %s1725_s13 = inlined_call_operand.hbm [shape: f32[2,8,32], index: 13, kind: output, shape index: {}]  }
   0x1   :  { %1732 = sst [smem:[#allocation11_spill]] %s1712_s0 }
   0x2   :  { %1733 = sst [smem:[#allocation12_spill]] %s1713_s1 }
   0x3   :  { %1734 = sst [smem:[#allocation13_spill]] %s1714_s2 }
   0x4   :  { %1735 = sst [smem:[#allocation14_spill]] %s1723_s11 }
   0x5   :  { %1736 = sst [smem:[#allocation15_spill]] %s1724_s12 }
   0x6   :  { %1737 = sst [smem:[#allocation16_spill]] %s1725_s13 }
   0x7   :  { %18 = vsyncpa [#allocation3], 0 }
   0x8   :  { %20 = vsyncpa [#allocation3 + $0x1], 0 }
   0x9   :  { %21 = vsyncpa [#allocation4], 0 }
   0xa   :  { %23 = vsyncpa [#allocation4 + $0x1], 0  ;;  %s1446_s25 = smov 0   ;;  %s1448_s26 = smov 0  }
   0xb   :  { %s1450_s27 = smov 0   ;;  %s1452_s28 = smov 0  }
   0xc   :  { %s1454_s29 = smov 0   ;;  %s1456_s30 = smov 0  }
   0xd LB: > { %1738 = sst [smem:[#allocation8_spill]] %s1342_s25  ;;  %s1114_s14 = sadd.s32 4294967295, %s1362_s30   ;;  %s1362_s30 = sphi %s1456_s30, %s29_s30   ;;  %s1358_s29 = sphi %s1454_s29, %s1759_s29   ;;  %s1354_s28 = sphi %s1452_s28, %s1758_s28   ;;  %s1350_s27 = sphi %s1450_s27, %s1757_s27   ;;  %s1346_s26 = sphi %s1448_s26, %s1756_s26   ;;  %s1342_s25 = sphi %s1446_s25, %s1755_s25  }
   0xe   : > { %s1115_s15 = sadd.s32 4294967294, %s1362_s30   ;;  %s41_s16 = sadd.s32 1, %s1358_s29 }
   0xf   : > { %s50_s17 = sadd.s32 1, %s1350_s27  ;;  %p43_p0 = scmp.ge.s32.totalorder %s41_s16, 2 }
  0x10   : > { %p57_p1 = scmp.ne.s32.totalorder %s1350_s27, %s1346_s26  ;;  %p58_p2 = scmp.eq.s32.totalorder %s1362_s30, 0 }
  0x11   : > { %p63_p3 = scmp.ne.s32.totalorder %s1346_s26, %s1342_s25  ;;  %s1761_s16 = smov (%p43_p0, %s41_s16), 0 }
  0x12   : > { %1739 = sst [smem:[#allocation9_spill]] %s1761_s16  ;;  %p1487_p4 = por %p58_p2, %p57_p1 }
  0x13   : > { %p64_p5 = scmp.eq.s32.totalorder %s1114_s14, 0  ;;  %s45_s19 = ssub.s32 %s1358_s29, %s1761_s16 }
  0x14   : > { %p341_p6 = scmp.eq.s32.totalorder %s1114_s14, 1  ;;  %p48_p7 = scmp.eq.s32.totalorder %s45_s19, 0 }
  0x15   : > { %p1493_p8 = por %p64_p5, %p63_p3  ;;  %p347_p10 = scmp.eq.s32.totalorder %s1115_s15, 1 }
  0x16   : > { %p1497_p9 = por %p341_p6, %p57_p1  ;;  %p1117_p12 = scmp.ge.s32.totalorder %s1362_s30, 2 }
  0x17   : > { %s1502_s22 = scalar_select %p48_p7, %s1350_s27, %s50_s17  }
  0x18   : > { %s1742_s21 = scalar_select %p1497_p9, 1, 0 }
  0x19   : > { %p1504_p11 = por %p347_p10, %p63_p3  ;;  %p1158_p13 = scmp.lt.s32.totalorder %s1362_s30, 2 }
  0x1a   : > { %1743 = sst [smem:[#allocation10_spill]] %s1742_s21  ;;  %s403_s24 = sand.u32 1, %s1350_s27  }
  0x1b   : > { %s1118_s14 = sshll.u32 %s403_s24, 3  ;;  %s1119_s19 = sshll.u32 %s1358_s29, 3 }
  0x1c   : > { %s1745_s0 = sld [smem:[#allocation11_spill]]  ;;  %s407_s13 = scalar_lea.vmem [#allocation2], %s1118_s14 }
  0x1d   : > { %s416_s21 = sshll.u32 %s407_s13, 4  ;;  %p1151_p0 = pnand %p1158_p13, %p1487_p4  ;;  %s417_s21 = int_to_ptr.vmem [resolvable:$true] %s416_s21 }
  0x1e   : > { %p1120_p1 = scmp.ge.s32.totalorder %s1362_s30, 1  ;;  %p421_p2 = scmp.lt.s32.totalorder %s1362_s30, 3 }
  0x1f   : > { %s404_s15 = scalar_lea.sflag [#allocation3], %s403_s24 }
  0x20   : > { %p422_p3 = pnand %p1120_p1, %p421_p2 }
  0x21   : > { %s1520_s17 = sand.u32 (!%p422_p3), 1, %s1346_s26  }
  0x22   : > { %s412_s12 = scalar_lea.hbm %s1745_s0, %s1119_s19  ;;  %425 = sbr.rel (%p422_p3) target bundleno = 2295 (0x8f7), region = 72 }
  0x23   : > { %s414_s11 = sshll.u32 %s412_s12, 4  ;;  %s1731_s25 = sshll.u32 (!%p422_p3), %s1520_s17, 3  ;;  %s415_s11 = int_to_ptr.hbm [resolvable:$true] %s414_s11 }
  0x24   : > { %1153 = dma.hbm_to_vmem [thread:$0]  (!%p1151_p0), %s415_s11, 128, %s417_s21, %s404_s15  }
  0x25   : > { %s428_s13 = scalar_lea.sflag (!%p422_p3), [#allocation3], %s1520_s17  ;;  %s431_s12 = scalar_lea.vmem (!%p422_p3), [#allocation2], %s1731_s25 }
  0x27   : > { %1333 = dma.done.wait (%p1493_p8), %s428_s13, 128  }
  0x28   : > { %1335 = vsyncadd (%p1493_p8), %s428_s13, 4294967168  ;;  %s1746_s1 = sld [smem:[#allocation12_spill]]  ;;  %v1542_v4 = vld [vmem:[%s431_s12] sm:$0xff]  ;;  %vm484_vm0 = vcmask 261120   ;;  %s1364_s16 = smov 88   ;;  %vm515_vm1 = vcmask 64512  }
  0x29   : > { %s1747_s2 = sld [smem:[#allocation13_spill]]  ;;  %s1365_s11 = smov 96   ;;  %v508_v8 = vld [vmem:[%s1715_s3] sm:$0xff]  ;;  %vm959_vm6 = vcmask 523264  }
  0x2a   : > { %s1366_s12 = smov 120   ;;  %s1367_s18 = smov 72   ;;  %685 = vmatpush.msra.mxu3 %v508_v8 }
  0x2b   : > { %s1368_s21 = smov 104   ;;  %s1369_s24 = smov 80  }
  0x2c   : > { %s1370_s15 = smov 64   ;;  %s1371_s20 = smov 112  }
  0x2d   : > { %s1372_s13 = smov 48   ;;  %s1751_s25 = sld [smem:[#allocation15_spill]] }
  0x2e   : > { %v479_v0 = vld [vmem:[%s1746_s1 + $0x18] sm:$0xff]  ;;  %v478_v1 = vld [vmem:[%s1746_s1 + $0x10] sm:$0xff]  ;;  %v477_v2 = vld [vmem:[%s1746_s1 + $0x8] sm:$0xff] }
  0x2f   : > { %500 = vmatpush.msra.mxu0 %v479_v0  ;;  %v476_v3 = vld [vmem:[%s1746_s1] sm:$0xff] }
  0x30   : > { %v1220_v5 = vld [vmem:[%s1747_s2] ss:$0 sm:$0xff] }
  0x31   : > { %501 = vmatpush.msra.mxu0 %v478_v1 }
  0x33   : > { %502 = vmatpush.msra.mxu0 %v477_v2  ;;  %v509_v2 = vld [vmem:[%s1715_s3 + $0x8] sm:$0xff] }
  0x35   : > { %503 = vmatpush.msra.mxu0 %v476_v3  ;;  %v510_v3 = vld [vmem:[%s1715_s3 + $0x10] sm:$0xff] }
  0x36   : > { %1123 = vmatmul.msk.f32.vlgmr.msra.gmra.mxu0 %vm484_vm0, %v1542_v4 }
  0xb3   : > { %v505_v6 = vpop.f32.mrf.mxu0 }
  0xb4   : > { %v1549_v7 = vadd.f32 %v1220_v5, %v505_v6 }
  0xb6   : > { %580 = vrot.lane.b32.xlu2 %v1549_v7, %s1364_s16  ;;  %513 = vrot.lane.b32.xlu0 %v1549_v7, %s1365_s11  ;;  %s1373_s16 = smov 56   ;;  %s1374_s11 = smov 40  }
  0xbe   : > { %578 = vrot.lane.b32.xlu2 %v1549_v7, %s1366_s12 }
  0xc6   : > { %782 = vrot.lane.b32.xlu2 %v1549_v7, %s1367_s18 }
  0xce   : > { %780 = vrot.lane.b32.xlu2 %v1549_v7, %s1368_s21  ;;  %s1749_s21 = sld [smem:[#allocation16_spill]] }
  0xd4   : > { %s1300_s12 = scalar_lea.hbm %s1749_s21, 16 }
  0xd6   : > { %692 = vrot.lane.b32.xlu2 %v1549_v7, %s1369_s24 }
 0x110   : > { %v581_v9 = vpop.permute.xlu2 %580 }
 0x111   : > { %1127 = vmatpush.xpose.msk.msrb.mxu0 %vm515_vm1, %v581_v9 }
 0x118   : > { %v579_v10 = vpop.permute.xlu2 %578 }
 0x119   : > { %1128 = vmatmul.msk.f32.vlgmr.msrb.gmra.mxu0 %vm515_vm1, %v579_v10 }
 0x120   : > { %v783_v11 = vpop.permute.xlu2 %782 }
 0x121   : > { %1136 = vmatpush.xpose.msk.msrb.mxu3 %vm515_vm1, %v783_v11 }
 0x128   : > { %v781_v12 = vpop.permute.xlu2 %780  ;;  %v514_v13 = vpop.permute.xlu0 %513 }
 0x129   : > { %1124 = vmatpush.xpose.msk.msra.mxu1 %vm515_vm1, %v514_v13  ;;  %v1221_v13 = vld [vmem:[%s1716_s4] ss:$0 sm:$0xff] }
 0x12c   : > { %1125 = vmatmul.msk.f32.vlgmr.msra.gmra.mxu1 %vm515_vm1, %v1549_v7 }
 0x12d   : > { %662 = vmatpush.msrb.mxu1 %v509_v2 }
 0x12f   : > { %774 = vmatpush.msra.mxu1 %v510_v3 }
 0x130   : > { %v693_v14 = vpop.permute.xlu2 %692 }
 0x131   : > { %1132 = vmatpush.xpose.msk.msra.mxu0 %vm515_vm1, %v693_v14 }
 0x196   : > { %v603_v15 = vpop.f32.mrf.mxu0 }
 0x197   : > { %v606_v16 = vmul.f32 0.35355338, %v603_v15 }
 0x199   : > { %v607_v17 = vsel %vm515_vm1, %v606_v16, -inf }
 0x19a   : > { %608 = vmax.xlane.f32.xlu2 %v607_v17 }
 0x1a9   : > { %v537_v18 = vpop.f32.mrf.mxu1 }
 0x1aa   : > { %v540_v19 = vmul.f32 0.35355338, %v537_v18 }
 0x1ac   : > { %v541_v20 = vsel %vm515_vm1, %v540_v19, -inf }
 0x1ad   : > { %542 = vmax.xlane.f32.xlu0 %v541_v20 }
 0x20d   : > { %v609_v35 = vpop.xlane.xlu2 %608 }
 0x20e   : > { %v610_v37 = vsub.f32 %v606_v16, %v609_v35  ;;  %v953_v35 = vld [vmem:[%s1721_s9 + $0x30] sm:$0xff] }
 0x210   : > { %v611_v38 = vmul.f32 1.442695, %v610_v37 }
 0x220   : > { %v543_v21 = vpop.xlane.xlu0 %542 }
 0x221   : > { %v544_v22 = vsub.f32 %v540_v19, %v543_v21  ;;  %v1375_v19 = vmov 32.0  }
 0x223   : > { %v545_v23 = vmul.f32 1.442695, %v544_v22 }
 0x225   : > { %1228 = vpow2.f32 %v545_v23 }
 0x22b   : > { %v1229_v24 = vpop.eup %1228 }
 0x22c   : > { %v547_v25 = vsel %vm515_vm1, %v1229_v24, 0.0 }
 0x22d   : > { %548 = vadd.xlane.f32.xlu1 %v547_v25 }
 0x246   : > { %552 = vrot.lane.b32.xlu1 %v1549_v7, %s1370_s15 }
 0x24e   : > { %690 = vrot.lane.b32.xlu1 %v1549_v7, %s1371_s20  ;;  %s1143_s20 = sshll.u32 %s1354_s28, 3  ;;  %s1752_s28 = sshll.u32 %s1520_s17, 3 }
 0x24f   : > { %s1029_s24 = scalar_lea.hbm %s1749_s21, %s1143_s20  ;;  %s474_s0 = scalar_lea.vmem [#allocation5], %s1752_s28 }
 0x250   : > { %s1031_s1 = sshll.u32 %s474_s0, 4  ;;  %s1033_s2 = sshll.u32 %s1029_s24, 4  ;;  %s1032_s1 = int_to_ptr.vmem [resolvable:$true] %s1031_s1  ;;  %s1034_s2 = int_to_ptr.hbm [resolvable:$true] %s1033_s2 }
 0x2a0   : > { %v549_v26 = vpop.xlane.xlu1 %548 }
 0x2a1   : > { %1230 = vrcp.f32 %v549_v26 }
 0x2a2   : > { %1232 = vpow2.f32 %v611_v38 }
 0x2a7   : > { %v1231_v27 = vpop.eup %1230 }
 0x2a8   : > { %v551_v29 = vmul.f32 %v1231_v27, %v1229_v24  ;;  %v1233_v45 = vpop.eup %1232 }
 0x2a9   : > { %v613_v46 = vsel %vm515_vm1, %v1233_v45, 0.0 }
 0x2b8   : > { %v553_v28 = vpop.permute.xlu1 %552 }
 0x2b9   : > { %573 = vmatpush.msra.mxu2 %v553_v28 }
 0x2ba   : > { %1126 = vmatmul.msk.f32.vlgmr.msra.gmra.mxu2 %vm515_vm1, %v551_v29 }
 0x2c0   : > { %v691_v30 = vpop.permute.xlu1 %690 }
 0x2c1   : > { %1133 = vmatmul.msk.f32.vlgmr.msra.gmra.mxu0 %vm515_vm1, %v691_v30  ;;  %v918_v30 = vld [vmem:[%s1719_s7 + $0x18] sm:$0xff] }
 0x33d   : > { %v575_v31 = vpop.f32.mrf.mxu2 }
 0x33e   : > { %1131 = vmatmul.msk.f32.vlgmr.msra.gmra.mxu3 %vm515_vm1, %v575_v31  ;;  %v715_v32 = vpop.f32.mrf.mxu0  ;;  %v917_v31 = vld [vmem:[%s1719_s7 + $0x10] sm:$0xff] }
 0x33f   : > { %v718_v33 = vmul.f32 0.35355338, %v715_v32  ;;  %v916_v32 = vld [vmem:[%s1719_s7 + $0x8] sm:$0xff] }
 0x341   : > { %v719_v34 = vsel %vm515_vm1, %v718_v33, -inf }
 0x342   : > { %720 = vmax.xlane.f32.xlu1 %v719_v34  ;;  %v954_v34 = vld [vmem:[%s1721_s9 + $0x38] sm:$0xff] }
 0x343   : > { %971 = vmatpush.msra.mxu3 %v954_v34 }
 0x345   : > { %972 = vmatpush.msra.mxu3 %v953_v35 }
 0x346   : > { %1137 = vmatmul.msk.f32.vlgmr.msrb.gmra.mxu3 %vm515_vm1, %v781_v12 }
 0x35b   : > { %730 = vrot.lane.b32.xlu1 %v1549_v7, %s1372_s13  ;;  %s1018_s13 = scalar_lea.sflag [#allocation4], %s1520_s17 }
 0x3b5   : > { %v721_v39 = vpop.xlane.xlu1 %720 }
 0x3b6   : > { %v722_v42 = vsub.f32 %v718_v33, %v721_v39  ;;  %v915_v33 = vld [vmem:[%s1719_s7] sm:$0xff] }
 0x3b7   : > { %v951_v39 = vld [vmem:[%s1721_s9 + $0x20] sm:$0xff] }
 0x3b8   : > { %v723_v44 = vmul.f32 1.442695, %v722_v42 }
 0x3ba   : > { %1234 = vpow2.f32 %v723_v44 }
 0x3c0   : > { %v1235_v47 = vpop.eup %1234 }
 0x3c1   : > { %v1578_v36 = vpop.f32.mrf.mxu3  ;;  %v725_v48 = vsel %vm515_vm1, %v1235_v47, 0.0 }
 0x3c9   : > { %v805_v40 = vpop.f32.mrf.mxu3 }
 0x3ca   : > { %v808_v41 = vmul.f32 0.35355338, %v805_v40 }
 0x3cc   : > { %v809_v43 = vsel %vm515_vm1, %v808_v41, -inf }
 0x3cd   : > { %810 = vmax.xlane.f32.xlu0 %v809_v43  ;;  %v731_v59 = vpop.permute.xlu1 %730 }
 0x3d5   : > { %614 = vadd.xlane.f32.xlu0 %v613_v46 }
 0x3dd   : > { %726 = vadd.xlane.f32.xlu0 %v725_v48  ;;  %v1222_v48 = vld [vmem:[%s1717_s5] ss:$0 sm:$0xff] }
 0x3f1   : > { %618 = vrot.lane.b32.xlu0 %v1549_v7, %s1373_s16  ;;  %s1294_s16 = sshra.s32 %s1034_s2, 4  ;;  %s1295_s16 = int_to_ptr.hbm [resolvable:$true] %s1294_s16 }
 0x3f2   : > { %s1296_s20 = scalar_lea.hbm %s1295_s16, 8  ;;  %p1301_p7 = scmp.lt.s32.totalorder %s1295_s16, %s1749_s21 }
 0x3f3   : > { %p1297_p4 = scmp.ne.s32.totalorder %s1295_s16, %s1296_s20  ;;  %p1302_p8 = scmp.lt.s32.totalorder %s1300_s12, %s1296_s20 }
 0x3f5   : > { %p1298_p5 = pnand %p1297_p4, %p1497_p9  ;;  %p1303_p10 = por %p1302_p8, %p1301_p7 }
 0x3f7   : > { %p1299_p6 = pneg %p1298_p5 }
 0x3f9   : > { %p1304_p13 = pnand %p1303_p10, %p1299_p6 }
 0x440   : > { %v811_v49 = vpop.xlane.xlu0 %810 }
 0x441   : > { %v812_v50 = vsub.f32 %v808_v41, %v811_v49  ;;  %v950_v41 = vld [vmem:[%s1721_s9 + $0x18] sm:$0xff] }
 0x443   : > { %v813_v51 = vmul.f32 1.442695, %v812_v50 }
 0x445   : > { %1236 = vpow2.f32 %v813_v51  ;;  %v1223_v51 = vld [vmem:[%s1718_s6] ss:$0 sm:$0xff] }
 0x448   : > { %v615_v54 = vpop.xlane.xlu0 %614 }
 0x449   : > { %1238 = vrcp.f32 %v615_v54  ;;  %v949_v54 = vld [vmem:[%s1721_s9 + $0x10] sm:$0xff] }
 0x44b   : > { %v1237_v52 = vpop.eup %1236 }
 0x44c   : > { %v815_v53 = vsel %vm515_vm1, %v1237_v52, 0.0 }
 0x44d   : > { %816 = vadd.xlane.f32.xlu2 %v815_v53 }
 0x44f   : > { %v1239_v56 = vpop.eup %1238 }
 0x450   : > { %v727_v55 = vpop.xlane.xlu0 %726  ;;  %v617_v58 = vmul.f32 %v1239_v56, %v1233_v45  ;;  %v947_v56 = vld [vmem:[%s1721_s9] sm:$0xff] }
 0x451   : > { %1240 = vrcp.f32 %v727_v55  ;;  %v948_v55 = vld [vmem:[%s1721_s9 + $0x8] sm:$0xff] }
 0x457   : > { %v1241_v60 = vpop.eup %1240 }
 0x458   : > { %v729_v61 = vmul.f32 %v1241_v60, %v1235_v47 }
 0x463   : > { %v619_v57 = vpop.permute.xlu0 %618 }
 0x464   : > { %639 = vmatpush.msrb.mxu2 %v619_v57  ;;  %v1224_v57 = vld [vmem:[%s1720_s8] ss:$0 sm:$0xff] }
 0x465   : > { %820 = vrot.lane.b32.xlu2 %v1549_v7, %s1374_s11  ;;  %1129 = vmatmul.msk.f32.vlgmr.msrb.gmra.mxu2 %vm515_vm1, %v617_v58  ;;  %v511_v7 = vld [vmem:[%s1715_s3 + $0x18] sm:$0xff]  ;;  %s1748_s11 = sld [smem:[#allocation14_spill]] }
 0x466   : > { %751 = vmatpush.msra.mxu2 %v731_v59 }
 0x468   : > { %864 = vmatpush.msrb.mxu2 %v511_v7 }
 0x46d   : > { %1134 = vmatmul.msk.f32.vlgmr.msra.gmra.mxu2 %vm515_vm1, %v729_v61  ;;  %v1225_v61 = vld [vmem:[%s1722_s10] ss:$0 sm:$0xff] }
 0x4c0   : > { %v817_v62 = vpop.xlane.xlu2 %816 }
 0x4c1   : > { %1242 = vrcp.f32 %v817_v62 }
 0x4c2   : > { %1244 = vrcp.f32 %v1375_v19 }
 0x4c7   : > { %v1243_v63 = vpop.eup %1242 }
 0x4c8   : > { %v819_v0 = vmul.f32 %v1243_v63, %v1237_v52  ;;  %v821_v1 = vpop.permute.xlu2 %820  ;;  %v1245_v20 = vpop.eup %1244 }
 0x4c9   : > { %841 = vmatpush.msrb.mxu0 %v821_v1  ;;  %v882_v21 = vmul.f32 32.0, %v1245_v20  ;;  %vm886_vm2 = vweird.f32 %v1245_v20 }
 0x4ca   : > { %1138 = vmatmul.msk.f32.vlgmr.msrb.gmra.mxu0 %vm515_vm1, %v819_v0 }
 0x4cb   : > { %v883_v22 = vsub.f32 1.0, %v882_v21 }
 0x4cd   : > { %v884_v23 = vmul.f32 %v1245_v20, %v883_v22 }
 0x4cf   : > { %v885_v24 = vadd.f32 %v1245_v20, %v884_v23 }
 0x4d1   : > { %v1607_v25 = vsel %vm886_vm2, %v1245_v20, %v885_v24  ;;  %v1227_v20 = vld [vmem:[%s1751_s25] ss:$0 sm:$0xff] }
 0x4e8   : > { %v641_v5 = vpop.f32.mrf.mxu2 }
 0x4e9   : > { %1130 = vmatmul.msk.f32.vlgmr.msrb.gmra.mxu1 %vm515_vm1, %v641_v5 }
 0x4ea   : > { %938 = vmatpush.msrb.mxu1 %v918_v30 }
 0x4ec   : > { %939 = vmatpush.msrb.mxu1 %v917_v31 }
 0x4ee   : > { %940 = vmatpush.msrb.mxu1 %v916_v32 }
 0x4f0   : > { %v753_v6 = vpop.f32.mrf.mxu2  ;;  %941 = vmatpush.msrb.mxu1 %v915_v33 }
 0x4f1   : > { %1135 = vmatmul.msk.f32.vlgmr.msra.gmra.mxu1 %vm515_vm1, %v753_v6 }
 0x547   : > { %v843_v8 = vpop.f32.mrf.mxu0 }
 0x548   : > { %1139 = vmatmul.msk.f32.vlgmr.msrb.gmra.mxu2 %vm515_vm1, %v843_v8 }
 0x566   : > { %v664_v9 = vpop.f32.mrf.mxu1 }
 0x567   : > { %v688_v11 = vadd.f32 %v1578_v36, %v664_v9  ;;  %v952_v36 = vld [vmem:[%s1721_s9 + $0x28] sm:$0xff] }
 0x568   : > { %973 = vmatpush.msra.mxu3 %v952_v36 }
 0x56a   : > { %974 = vmatpush.msra.mxu3 %v951_v39 }
 0x56c   : > { %975 = vmatpush.msra.mxu3 %v950_v41 }
 0x56e   : > { %v776_v10 = vpop.f32.mrf.mxu1  ;;  %976 = vmatpush.msra.mxu3 %v949_v54 }
 0x56f   : > { %v779_v12 = vadd.f32 %v776_v10, %v688_v11 }
 0x570   : > { %977 = vmatpush.msra.mxu3 %v948_v55 }
 0x572   : > { %978 = vmatpush.msra.mxu3 %v947_v56 }
 0x5cb   : > { %v866_v14 = vpop.f32.mrf.mxu2 }
 0x5cc   : > { %v869_v15 = vadd.f32 %v866_v14, %v779_v12 }
 0x5ce   : > { %v874_v16 = vadd.f32 %v1221_v13, %v869_v15 }
 0x5d0   : > { %v875_v17 = vadd.f32 %v874_v16, %v1542_v4 }
 0x5d2   : > { %v878_v18 = vsel %vm484_vm0, %v875_v17, 0.0 }
 0x5d3   : > { %879 = vadd.xlane.f32.xlu0 %v878_v18 }
 0x646   : > { %v880_v26 = vpop.xlane.xlu0 %879 }
 0x647   : > { %v888_v27 = vmul.f32 %v1607_v25, %v880_v26 }
 0x649   : > { %v889_v28 = vsub.f32 %v875_v17, %v888_v27  ;;  %v1226_v17 = vld [vmem:[%s1748_s11] ss:$0 sm:$0xff] }
 0x64b   : > { %v890_v29 = vmul.f32 %v889_v28, %v889_v28 }
 0x64d   : > { %v891_v4 = vsel %vm484_vm0, %v890_v29, 0.0 }
 0x64e   : > { %892 = vadd.xlane.f32.xlu1 %v891_v4 }
 0x6c1   : > { %v893_v37 = vpop.xlane.xlu1 %892 }
 0x6c2   : > { %v894_v38 = vmul.f32 %v893_v37, %v1607_v25 }
 0x6c4   : > { %v895_v40 = vadd.f32 1e-05, %v894_v38 }
 0x6c6   : > { %1246 = vrsqrt.f32 %v895_v40  ;;  %vm902_vm4 = vweird.f32 %v895_v40 }
 0x6cc   : > { %v1247_v42 = vpop.eup %1246 }
 0x6cd   : > { %v897_v43 = vmul.f32 %v1247_v42, %v895_v40  ;;  %vm903_vm3 = vweird.f32 %v1247_v42 }
 0x6ce   : > { %vm904_vm5 = vmor %vm902_vm4, %vm903_vm3 }
 0x6cf   : > { %v898_v44 = vmul.f32 %v1247_v42, %v897_v43 }
 0x6d1   : > { %v899_v45 = vmul.f32 0.5, %v898_v44 }
 0x6d3   : > { %v900_v46 = vsub.f32 1.5, %v899_v45 }
 0x6d5   : > { %v901_v47 = vmul.f32 %v1247_v42, %v900_v46 }
 0x6d7   : > { %v905_v49 = vsel %vm904_vm5, %v1247_v42, %v901_v47 }
 0x6d8   : > { %v906_v50 = vmul.f32 %v905_v49, %v889_v28 }
 0x6da   : > { %v910_v52 = vmul.f32 %v1222_v48, %v906_v50 }
 0x6dc   : > { %v914_v53 = vadd.f32 %v1223_v51, %v910_v52 }
 0x6de   : > { %1140 = vmatmul.msk.f32.vlgmr.msrb.gmra.mxu1 %vm484_vm0, %v914_v53 }
 0x75b   : > { %v943_v58 = vpop.f32.mrf.mxu1 }
 0x75c   : > { %v944_v59 = vadd.f32 %v1224_v57, %v943_v58 }
 0x75e   : > { %v946_v60 = vmax.f32 %v944_v59, 0.0 }
 0x760   : > { %1141 = vmatmul.msk.f32.vlgmr.msra.gmra.mxu3 %vm959_vm6, %v946_v60 }
 0x7e3   : > { %v980_v62 = vpop.f32.mrf.mxu3 }
 0x7e4   : > { %v981_v63 = vadd.f32 %v1225_v61, %v980_v62 }
 0x7e6   : > { %v983_v0 = vadd.f32 %v981_v63, %v914_v53 }
 0x7e8   : > { %v986_v1 = vsel %vm484_vm0, %v983_v0, 0.0 }
 0x7e9   : > { %987 = vadd.xlane.f32.xlu2 %v986_v1 }
 0x85c   : > { %v988_v2 = vpop.xlane.xlu2 %987 }
 0x85d   : > { %v989_v3 = vmul.f32 %v988_v2, %v1607_v25 }
 0x85f   : > { %v990_v5 = vsub.f32 %v983_v0, %v989_v3 }
 0x861   : > { %v991_v6 = vmul.f32 %v990_v5, %v990_v5 }
 0x863   : > { %v992_v7 = vsel %vm484_vm0, %v991_v6, 0.0 }
 0x864   : > { %993 = vadd.xlane.f32.xlu0 %v992_v7 }
 0x8d7   : > { %v994_v8 = vpop.xlane.xlu0 %993 }
 0x8d8   : > { %v995_v9 = vmul.f32 %v994_v8, %v1607_v25 }
 0x8da   : > { %v996_v10 = vadd.f32 1e-05, %v995_v9 }
 0x8dc   : > { %1248 = vrsqrt.f32 %v996_v10  ;;  %vm1003_vm8 = vweird.f32 %v996_v10 }
 0x8e2   : > { %v1249_v11 = vpop.eup %1248 }
 0x8e3   : > { %v998_v12 = vmul.f32 %v1249_v11, %v996_v10  ;;  %vm1004_vm7 = vweird.f32 %v1249_v11 }
 0x8e4   : > { %vm1005_vm9 = vmor %vm1003_vm8, %vm1004_vm7 }
 0x8e5   : > { %v999_v13 = vmul.f32 %v1249_v11, %v998_v12 }
 0x8e7   : > { %v1000_v14 = vmul.f32 0.5, %v999_v13 }
 0x8e9   : > { %v1001_v15 = vsub.f32 1.5, %v1000_v14 }
 0x8eb   : > { %v1002_v16 = vmul.f32 %v1249_v11, %v1001_v15 }
 0x8ed   : > { %v1006_v18 = vsel %vm1005_vm9, %v1249_v11, %v1002_v16 }
 0x8ee   : > { %v1007_v19 = vmul.f32 %v1006_v18, %v990_v5 }
 0x8f0   : > { %v1011_v21 = vmul.f32 %v1226_v17, %v1007_v19 }
 0x8f2   : > { %v1015_v22 = vadd.f32 %v1227_v20, %v1011_v21 }
 0x8f4   : > { %1016 = vst.msk [vmem:[%s474_s0] sm:$0xff] %vm484_vm0, %v1015_v22 }
 0x8f5   : > { %1307 = shalt.err (!%p1304_p13)
}
 0x8f6   : > { %1148 = dma.vmem_to_hbm [thread:$0]  (%p1497_p9), %s1032_s1, 128, %s1034_s2, %s1018_s13  }
 0x8f7 PF: > { %s1753_s0 = sld [smem:[#allocation8_spill]]  ;;  %p1155_p0 = pnand %p1117_p12, %p1504_p11 }
 0x8f9   : > { %p1156_p1 = pneg %p1155_p0 }
 0x8fd   : > { %s1045_s17 = sand.u32 1, %s1753_s0  }
 0x8fe   : > { %s1046_s19 = scalar_lea.sflag [#allocation4], %s1045_s17 }
 0x8ff   : > { %1337 = dma.done.wait (%p1156_p1), %s1046_s19, 128  }
 0x900   : > { %1339 = vsyncadd (%p1156_p1), %s1046_s19, 4294967168  ;;  %s29_s30 = sadd.s32 1, %s1362_s30   ;;  %s1754_s1 = sld [smem:[#allocation9_spill]] }
 0x901   : > { %p26_p2 = scmp.ge.s32.totalorder %s29_s30, 4   ;;  %s1755_s25 = smov %s1346_s26 }
 0x902   : > { %s1756_s26 = smov %s1350_s27  ;;  %s1757_s27 = smov %s1502_s22 }
 0x903   : > { %s1758_s28 = smov %s1358_s29  ;;  %28 = sbr.rel (!%p26_p2) target bundleno = 13 (0xd), region = 117 }
 0x906   : > { %s1759_s29 = smov %s1754_s1 }
 0x908   :  { %1052 = vsyncpa [#allocation3], 1 }
 0x909   :  { %1054 = vsyncpa [#allocation3 + $0x1], 1 }
 0x90a   :  { %1055 = vsyncpa [#allocation4], 1 }
 0x90b   :  { %1057 = vsyncpa [#allocation4 + $0x1], 1 }

</bundles_post_ra>
